<compile_context>
chip_gen: v6e
topology: v6e:2x2x1
jax: 0.10.0
libtpu: 0.0.40
codegen_flags: <defaults>
</compile_context>

<pallas_src>
import functools
import math

import jax
import jax.numpy as jnp
from jax.experimental import pallas as pl
from jax.experimental.pallas import tpu as pltpu

LANES = 128
TARGET_TILE_BYTES = 2 << 20      # ~2 MiB of native-dtype data per grid step
MAX_ACCUMULATORS = 8             # independent (8, 128) vreg accumulators


def _num_tensorcores() -> int:
    """Best-effort TensorCores per chip: 2 on v7x, 1 on v5e/v6e (and fallback)."""
    try:
        kind = jax.devices()[0].device_kind.lower()
    except Exception:
        return 1
    return 2 if "v7" in kind else 1


def _hinge_partials_kernel(x_ref, part_ref, *, sign, rows, tr, bpc,
                           n_blocks, n_acc, last_ragged, may_overrun):
    """Grid = (chunk, block).  Accumulates per-chunk partial hinge sums.

    x_ref    : (tr, LANES) tile of the flattened input (native dtype).
    part_ref : (1, n_acc, 8, LANES) f32 accumulator (output block, resident in
               VMEM across the inner 'arbitrary' axis).
    """
    c = pl.program_id(0)
    b = pl.program_id(1)
    blk = c * bpc + b                     # logical (unclamped) block index

    @pl.when(b == 0)
    def _init():
        part_ref[...] = jnp.zeros_like(part_ref)

    def accumulate(mask_tail_rows):
        x = x_ref[...].astype(jnp.float32)
        hinge = jnp.maximum(1.0 + sign * x, 0.0)          # relu(1 + sign*x)
        if mask_tail_rows:
            # Row-only mask for the single partial last block: the input DMA
            # was clipped at the array edge, so rows >= `rows` hold garbage.
            # (Row indices stay far below 2^31 for any realistic n, unlike a
            # flat 32-bit element index.)
            row = jax.lax.broadcasted_iota(jnp.int32, (tr, LANES), 0)
            hinge = jnp.where(blk * tr + row < rows, hinge, 0.0)
        # Fold the tile into n_acc independent (8, LANES) vreg accumulators:
        # pure VPU vreg adds (no cross-lane work); the n_acc independent add
        # chains keep all VALU slots busy instead of one serial tr/8-long
        # dependence chain.  The reshape is a no-copy (8,128)-vreg regrouping.
        part_ref[...] += hinge.reshape(
            tr // (8 * n_acc), n_acc, 8, LANES).sum(axis=0)[None]

    if last_ragged:
        @pl.when(blk < n_blocks - 1)      # interior blocks: unmasked fast path
        def _interior():
            accumulate(False)

        @pl.when(blk == n_blocks - 1)     # single tail block: cheap row mask
        def _tail():
            accumulate(True)
        # blk >= n_blocks (duplicated clamped blocks on the multi-chunk path)
        # falls through both branches and contributes nothing.
    elif may_overrun:
        @pl.when(blk < n_blocks)
        def _interior():
            accumulate(False)
    else:
        accumulate(False)                 # exact tiling: zero masking/branching


def nowcasting_loss(x, real_flag):
    """Pallas TPU implementation of NowcastingLoss.forward.

    Args:
        x: any-shaped array (e.g. NCHW discriminator scores), any float dtype.
        real_flag: static Python bool.  NOTE: mirrors the PyTorch module's
            `if real_flag is True` check, so only the Python literal True
            flips the sign (numpy / traced bools fall into the 'fake' branch).
    Returns:
        scalar f32 loss (mean of relu(1 + sign*x)).
    """
    sign = -1.0 if real_flag is True else 1.0

    x = jnp.asarray(x)                    # keep native dtype; cast in-kernel
    flat = x.reshape(-1)                  # layout-preserving (bitcast) reshape
    n = flat.shape[0]
    if n == 0:                            # torch mean of empty tensor -> nan
        return jnp.float32(jnp.nan)

    itemsize = max(1, x.dtype.itemsize)
    sub = 8 * max(1, 4 // itemsize)       # native sublane tile: f32→8 bf16→16 int8→32

    # Lane-aligned prefix goes through the kernel; the <=127-element tail is
    # summed wrapper-side (no whole-tensor pad copy for unaligned n).
    n_main = (n // LANES) * LANES
    rows = n_main // LANES

    tail_sum = jnp.float32(0.0)
    if n_main != n:
        t = flat[n_main:].astype(jnp.float32)
        tail_sum = jnp.sum(jnp.maximum(1.0 + sign * t, 0.0))

    if rows < sub:
        # Too small for even one native (sub, 128) tile: plain JAX fallback
        # (kernel launch overhead would dominate at this size anyway).
        head_sum = jnp.float32(0.0)
        if rows > 0:
            h = flat[:n_main].astype(jnp.float32)
            head_sum = jnp.sum(jnp.maximum(1.0 + sign * h, 0.0))
        return (head_sum + tail_sum) * jnp.float32(1.0 / n)

    head = flat if n_main == n else flat[:n_main]
    x2d = head.reshape(rows, LANES)       # free bitcast when n is lane-aligned

    # --- Row tile sized by BYTES of native data (~2 MiB per step) ----------
    # Keeps bf16/int8 tiles as large as f32 ones while the double-buffered
    # input + in-kernel f32 intermediates stay well under every generation's
    # scoped-VMEM default (16/32/32 MiB on v5e/v6e/v7x).
    align = (8 * MAX_ACCUMULATORS) * sub // math.gcd(8 * MAX_ACCUMULATORS, sub)
    tr_big = max(align, (TARGET_TILE_BYTES // (LANES * itemsize)) // align * align)
    tr = min(tr_big, (rows // sub) * sub)          # multiple of sub, sub<=tr<=rows
    n_acc = math.gcd(tr // 8, MAX_ACCUMULATORS)    # independent vreg accumulators

    n_blocks = -(-rows // tr)
    last_ragged = (rows % tr) != 0

    # --- Chunk axis: one chunk per TensorCore (2 on v7x, 1 on v5e/v6e) -----
    n_tc = _num_tensorcores()
    n_chunks = n_tc if n_blocks >= n_tc else 1
    bpc = -(-n_blocks // n_chunks)
    may_overrun = (n_chunks * bpc) != n_blocks

    if may_overrun:
        last_blk = n_blocks - 1

        def in_map(c, b):
            # Clamp so the DMA source stays in range; the duplicated blocks
            # are skipped (no accumulation) inside the kernel.
            return (jnp.minimum(c * bpc + b, last_blk), 0)
    else:
        def in_map(c, b):
            return (c * bpc + b, 0)

    in_spec_kwargs = {}
    if n_tc > 1:
        # v7x: a third input buffer hides DMA-issue jitter behind the very
        # short per-tile compute (3 x ~2 MiB << 32 MiB scoped default).
        in_spec_kwargs["pipeline_mode"] = pl.Buffered(3)
    in_spec = pl.BlockSpec((tr, LANES), in_map, **in_spec_kwargs)

    kernel = functools.partial(
        _hinge_partials_kernel,
        sign=sign, rows=rows, tr=tr, bpc=bpc, n_blocks=n_blocks,
        n_acc=n_acc, last_ragged=last_ragged, may_overrun=may_overrun,
    )

    dim_sem = (
        pltpu.CORE_PARALLEL if n_chunks > 1 else pltpu.ARBITRARY,  # chunk axis
        pltpu.ARBITRARY,                                           # streaming axis
    )

    cost = pl.CostEstimate(
        flops=2 * n_main,
        transcendentals=0,
        bytes_accessed=n_main * itemsize + n_chunks * n_acc * 8 * LANES * 4,
    )

    partials = pl.pallas_call(
        kernel,
        out_shape=jax.ShapeDtypeStruct((n_chunks, n_acc, 8, LANES), jnp.float32),
        grid_spec=pltpu.PrefetchScalarGridSpec(
            num_scalar_prefetch=0,
            grid=(n_chunks, bpc),
            in_specs=[in_spec],
            out_specs=pl.BlockSpec((1, n_acc, 8, LANES), lambda c, b: (c, 0, 0, 0)),
        ),
        compiler_params=pltpu.CompilerParams(dimension_semantics=dim_sem),
        cost_estimate=cost,
    )(x2d)

    # Tiny cross-chunk / cross-lane finish (<= n_chunks*n_acc*1024 f32) + mean.
    return (jnp.sum(partials) + tail_sum) * jnp.float32(1.0 / n)


def _reference(x, real_flag):
    x = jnp.asarray(x, jnp.float32)
    if real_flag is True:
        x = -x
    return jnp.mean(jax.nn.relu(1.0 + x))


if __name__ == "__main__":
    key = jax.random.PRNGKey(0)
    loss = jax.jit(nowcasting_loss, static_argnums=1)

    k0, k1, k2 = jax.random.split(key, 3)
    cases = [
        jax.random.normal(k0, (2, 4, 16, 16), dtype=jnp.float32),   # NCHW, lane-aligned
        jax.random.normal(k1, (37, 128), dtype=jnp.float32),        # ragged row tail
        jax.random.normal(k2, (3, 5, 11, 13), dtype=jnp.float32),   # non-128-aligned n
    ]

    ok = True
    for xi in cases:
        for flag in (True, False):
            got = jax.block_until_ready(loss(xi, flag))
            want = jax.block_until_ready(_reference(xi, flag))
            if not jnp.allclose(got, want, rtol=1e-5, atol=1e-6):
                ok = False
                print(f"MISMATCH shape={xi.shape} flag={flag}: got {got}, want {want}")

    if ok:
        print("KERNEL_OK")
</pallas_src>

<mosaic_0001>
module attributes {stable_mosaic.version = 11 : i64} {
  func.func @_hinge_partials_kernel(%arg0: i32, %arg1: i32, %arg2: memref<16x128xf32, #tpu.memory_space<vmem>>, %arg3: memref<1x2x8x128xf32, #tpu.memory_space<vmem>>) attributes {dimension_semantics = [#tpu.dimension_semantics<arbitrary>, #tpu.dimension_semantics<arbitrary>], iteration_bounds = array<i64: 1, 1>, scalar_prefetch = 0 : i64, scratch_operands = 0 : i64, tpu.core_type = #tpu.core_type<tc>, window_params = [{transform_indices = @transform_0, window_bounds = array<i64: 16, 128>}, {transform_indices = @transform_1, window_bounds = array<i64: 1, 2, 8, 128>}]} {
    %c0_i32 = arith.constant 0 : i32
    %0 = arith.cmpi eq, %arg1, %c0_i32 : i32
    %1 = arith.extui %0 : i1 to i32
    %c0_i32_0 = arith.constant 0 : i32
    %2 = arith.cmpi ne, %1, %c0_i32_0 : i32
    scf.if %2 {
      %cst_13 = arith.constant 0.000000e+00 : f32
      %16 = vector.broadcast %cst_13 : f32 to vector<1x2x8x128xf32>
      %c0_14 = arith.constant 0 : index
      %c0_15 = arith.constant 0 : index
      %c0_16 = arith.constant 0 : index
      %c0_17 = arith.constant 0 : index
      %17 = vector.load %arg3[%c0_14, %c0_15, %c0_16, %c0_17] : memref<1x2x8x128xf32, #tpu.memory_space<vmem>>, vector<1x2x8x128xf32>
      tpu.vector_store %arg3[%c0_14, %c0_15, %c0_16, %c0_17], %16 {strides = array<i32>} : memref<1x2x8x128xf32, #tpu.memory_space<vmem>>, vector<1x2x8x128xf32>,
    } else {
    }
    %c0 = arith.constant 0 : index
    %c0_1 = arith.constant 0 : index
    %3 = vector.load %arg2[%c0, %c0_1] : memref<16x128xf32, #tpu.memory_space<vmem>>, vector<16x128xf32>
    %cst = arith.constant -1.000000e+00 : f32
    %4 = vector.broadcast %cst : f32 to vector<16x128xf32>
    %5 = arith.mulf %4, %3 : vector<16x128xf32>
    %cst_2 = arith.constant 1.000000e+00 : f32
    %6 = vector.broadcast %cst_2 : f32 to vector<16x128xf32>
    %7 = arith.addf %6, %5 : vector<16x128xf32>
    %cst_3 = arith.constant 0.000000e+00 : f32
    %8 = vector.broadcast %cst_3 : f32 to vector<16x128xf32>
    %9 = arith.maximumf %7, %8 : vector<16x128xf32>
    %c0_4 = arith.constant 0 : index
    %c0_5 = arith.constant 0 : index
    %c0_6 = arith.constant 0 : index
    %c0_7 = arith.constant 0 : index
    %10 = vector.load %arg3[%c0_4, %c0_5, %c0_6, %c0_7] : memref<1x2x8x128xf32, #tpu.memory_space<vmem>>, vector<1x2x8x128xf32>
    %11 = vector.shape_cast %9 : vector<16x128xf32> to vector<1x2x8x128xf32>
    %cst_8 = arith.constant dense<0.000000e+00> : vector<2x8x128xf32>
    %12 = vector.multi_reduction <add>, %11, %cst_8 [0] : vector<1x2x8x128xf32> to vector<2x8x128xf32>
    %13 = vector.shape_cast %12 : vector<2x8x128xf32> to vector<1x2x8x128xf32>
    %14 = arith.addf %10, %13 : vector<1x2x8x128xf32>
    %c0_9 = arith.constant 0 : index
    %c0_10 = arith.constant 0 : index
    %c0_11 = arith.constant 0 : index
    %c0_12 = arith.constant 0 : index
    %15 = vector.load %arg3[%c0_9, %c0_10, %c0_11, %c0_12] : memref<1x2x8x128xf32, #tpu.memory_space<vmem>>, vector<1x2x8x128xf32>
    tpu.vector_store %arg3[%c0_9, %c0_10, %c0_11, %c0_12], %14 {strides = array<i32>} : memref<1x2x8x128xf32, #tpu.memory_space<vmem>>, vector<1x2x8x128xf32>,
    return
  }
  func.func @transform_0(%arg0: i32, %arg1: i32) -> (i32, i32) {
    %c1_i32 = arith.constant 1 : i32
    %0 = arith.muli %arg0, %c1_i32 : i32
    %1 = arith.addi %0, %arg1 : i32
    %c0_i32 = arith.constant 0 : i32
    %c0_i32_0 = arith.constant 0 : i32
    return %1, %c0_i32 : i32, i32
  }
  func.func @transform_1(%arg0: i32, %arg1: i32) -> (i32, i32, i32, i32) {
    %c0_i32 = arith.constant 0 : i32
    %c0_i32_0 = arith.constant 0 : i32
    %c0_i32_1 = arith.constant 0 : i32
    %c0_i32_2 = arith.constant 0 : i32
    return %arg0, %c0_i32, %c0_i32_0, %c0_i32_1 : i32, i32, i32, i32
  }
}

</mosaic_0001>

<bundles_post_ra>
// kernel: nowcasting_loss.1
= control target key start
LH: loop header
LB: loop body
LE: loop exit
PB: predicated region body
PF: predicated region fallthrough
CT: control target
= control target key end

     0   :  { %s85_s0 = inlined_call_operand.vmem [shape: f32[16,128], index: 0, kind: input, shape index: {}]   ;;  %s86_s1 = inlined_call_operand.vmem [shape: f32[1,2,8,128], index: 1, kind: output, shape index: {}]  }
   0x1   :  { %v36_v0 = vld [vmem:[%s85_s0] sm:$0xff]  ;;  %v37_v1 = vld [vmem:[%s85_s0 + $0x8] sm:$0xff] }
   0x2   :  { %v38_v2 = vmul.f32 -1.0, %v36_v0  ;;  %v39_v3 = vmul.f32 -1.0, %v37_v1 }
   0x4   :  { %v40_v4 = vadd.f32 1.0, %v38_v2  ;;  %v41_v5 = vadd.f32 1.0, %v39_v3 }
   0x6   :  { %v42_v6 = vmax.f32 %v40_v4, 0.0  ;;  %v43_v7 = vmax.f32 %v41_v5, 0.0 }
   0x8   :  { %50 = vst [vmem:[%s86_s1] sm:$0xff] %v42_v6  ;;  %51 = vst [vmem:[%s86_s1 + $0x8] sm:$0xff] %v43_v7 }

</bundles_post_ra>
